<compile_context>
chip_gen: v5e
topology: v5e:2x2
jax: 0.10.0
libtpu: 0.0.40
codegen_flags: <defaults>
</compile_context>

<pallas_src>
import numpy as np
import jax
import jax.numpy as jnp
from jax.experimental import pallas as pl
from jax.experimental.pallas import tpu as pltpu

LANE = 128       # hidden feature width inside the kernel (full lane width)
GATE_OFF = 64    # lane offset where gate pre-activations are packed; a roll by 64
                 # on a 128-lane axis is direction-agnostic (64 == 128 - 64)


def _round_up(x, m):
    return ((x + m - 1) // m) * m


# ----------------------------------------------------------------------------------
# Representation bookkeeping (mirrors emlp's uniform_rep / gated / gate_indices)
# ----------------------------------------------------------------------------------
def _lambertW(ch, d):
    max_rank = 0
    while (max_rank + 1) * d ** max_rank <= ch:
        max_rank += 1
    return max_rank - 1


def uniform_rep_structure(ch, d=3):
    """Returns (hidden_dim, gate_idx list, num_gates) for uniform_rep(ch, SO2eR3)."""
    Ns = np.zeros(_lambertW(ch, d) + 1, dtype=np.int64)
    rem = ch
    while rem > 0:
        max_rank = _lambertW(rem, d)
        Ns[: max_rank + 1] += np.array(
            [d ** (max_rank - r) for r in range(max_rank + 1)], dtype=np.int64
        )
        rem -= (max_rank + 1) * d ** max_rank
    hidden_dim = int(sum(int(Ns[r]) * d ** r for r in range(len(Ns))))
    assert hidden_dim == ch
    gate_idx = []
    for i in range(int(Ns[0])):          # scalars gate themselves
        gate_idx.append(i)
    gate_pos = hidden_dim                # non-scalar irreps get appended gate scalars
    for r in range(1, len(Ns)):
        dim_r = d ** r
        for _ in range(int(Ns[r])):
            gate_idx.extend([gate_pos] * dim_r)
            gate_pos += 1
    num_gates = gate_pos - hidden_dim
    return hidden_dim, gate_idx, num_gates


# ----------------------------------------------------------------------------------
# Pallas kernel: full actor forward (2 gated EMLP blocks + final linear + tanh)
# ----------------------------------------------------------------------------------
def _actor_kernel(x_ref, wc1_ref, wc2_ref, w3_ref, b2_ref, b3_ref, mean_ref):
    # x: (tile_b, in_pad) f32.  Column `d_in` carries 1.0 so b1 is folded into wc1.
    x = x_ref[...]

    def eup_sigmoid(z):
        # sigmoid(z) == 0.5*tanh(0.5*z) + 0.5 : one EUP transcendental, no divide.
        return 0.5 * jnp.tanh(0.5 * z) + 0.5

    def gated(pre):
        # Value pre-activations live in lanes [0, H); gate pre-activations were
        # packed offline (W @ gsel) into lanes [GATE_OFF, GATE_OFF+H).  A lane roll
        # by 64 (XLU slot, off the VALU/MXU path) aligns gates with values.
        gate = pltpu.roll(pre, shift=GATE_OFF, axis=1)
        return eup_sigmoid(gate) * pre

    # EMLPBlock 1 (bias folded into wc1 through the ones-column of x).
    h = gated(jnp.dot(x.astype(jnp.bfloat16), wc1_ref[...],
                      preferred_element_type=jnp.float32))
    # EMLPBlock 2.  Lanes >= hidden_dim of h hold gate/garbage values; they never
    # propagate because wc2 rows >= hidden_dim are zero (enforced in the wrapper).
    h = gated(jnp.dot(h.astype(jnp.bfloat16), wc2_ref[...],
                      preferred_element_type=jnp.float32) + b2_ref[...])
    out = jnp.dot(h.astype(jnp.bfloat16), w3_ref[...],
                  preferred_element_type=jnp.float32) + b3_ref[...]
    mean_ref[...] = jnp.tanh(out)


# ----------------------------------------------------------------------------------
# Chip detection / tiling
# ----------------------------------------------------------------------------------
def _chip_info():
    """(num_tensorcores, vmem_capacity_bytes) with safe fallbacks."""
    num_tc, vmem_cap = 1, 64 << 20          # conservative defaults (v7x VMEM is smallest)
    try:
        kind = jax.devices()[0].device_kind.lower()
        if ("v7" in kind) or ("7x" in kind):
            num_tc = 2                       # v7x: 2 TensorCores / chip, 64 MiB VMEM
        else:
            vmem_cap = 128 << 20             # v5e / v6e: 1 TC, 128 MiB VMEM
    except Exception:
        pass
    try:
        vmem_cap = int(pltpu.get_tpu_info().vmem_capacity_bytes)
    except Exception:
        pass
    return num_tc, vmem_cap


def _per_row_vmem_bytes(in_pad, out_pad):
    # ~6 live f32 (tile_b,128) intermediates + double-buffered narrow I/O tiles.
    return 6 * LANE * 4 + 2 * (in_pad + out_pad) * 4


def _choose_tile(b_rows, in_pad, out_pad, num_tc, vmem_cap, tile_b_max):
    b8 = _round_up(max(b_rows, 1), 8)
    if b8 <= 16:
        return b8
    budget = min(vmem_cap // 2, 24 << 20)                       # ample headroom
    cap = max(8, min(int(tile_b_max),
                     (budget // _per_row_vmem_bytes(in_pad, out_pad)) // 8 * 8))
    if num_tc <= 1:
        # Single TensorCore (v5e/v6e): one grid step when the batch fits the cap.
        tile = min(cap, b8)
    else:
        # v7x: keep >= num_tc grid steps so ("parallel",) can shard across both TCs.
        tile = min(cap, _round_up((b8 + num_tc - 1) // num_tc, 8))
    return max(8, tile)


# ----------------------------------------------------------------------------------
# Weight packing
# ----------------------------------------------------------------------------------
def _fuse_block_weight(w, b, gsel, hidden_dim, rows, bias_row=None):
    """Pack value cols at lanes [0,H) and (W @ gsel) gate cols at [GATE_OFF,GATE_OFF+H).

    If `bias_row` is given, the (gate-folded) bias is written into that weight row so
    a ones-column in the input realizes the bias add (exact fold, modulo bf16 rounding
    of the bias itself).  Rows >= w.shape[0] stay zero (garbage-lane annihilation).
    Returns (bf16 weight, f32 (1,LANE) residual bias)."""
    w = jnp.asarray(w, jnp.float32)
    b = jnp.asarray(b, jnp.float32)
    wc = jnp.zeros((rows, LANE), jnp.float32)
    wc = wc.at[: w.shape[0], :hidden_dim].set(w[:, :hidden_dim])
    wc = wc.at[: w.shape[0], GATE_OFF: GATE_OFF + hidden_dim].set(jnp.dot(w, gsel))
    bc = jnp.zeros((LANE,), jnp.float32)
    bc = bc.at[:hidden_dim].set(b[:hidden_dim])
    bc = bc.at[GATE_OFF: GATE_OFF + hidden_dim].set(jnp.dot(b, gsel))
    if bias_row is not None:
        wc = wc.at[bias_row, :].set(bc)
        bc = jnp.zeros((LANE,), jnp.float32)
    return wc.astype(jnp.bfloat16), bc.reshape(1, LANE)


# ----------------------------------------------------------------------------------
# Dense (XLA) fallback for tiny batches
# ----------------------------------------------------------------------------------
def _dense_forward(state, params, gate_idx, hidden_dim):
    idx = np.asarray(gate_idx)

    def block(h, w, b):
        pre = jnp.dot(h, jnp.asarray(w, jnp.float32)) + jnp.asarray(b, jnp.float32)
        return jax.nn.sigmoid(pre[:, idx]) * pre[:, :hidden_dim]

    h = block(state, params["w1"], params["b1"])
    h = block(h, params["w2"], params["b2"])
    out = jnp.dot(h, jnp.asarray(params["w3"], jnp.float32)) + jnp.asarray(params["b3"], jnp.float32)
    return jnp.tanh(out)


# ----------------------------------------------------------------------------------
# Wrapper: weight fusion, padding, tiling, pallas_call
# ----------------------------------------------------------------------------------
def emlp_mono_actor_forward(state, params, gate_idx, hidden_dim, action_dim,
                            tile_b_max=4096, xla_fallback_below=256):
    assert hidden_dim <= GATE_OFF, "gate packing assumes hidden_dim <= 64"
    B, d_in = state.shape
    state = jnp.asarray(state, jnp.float32)

    # std is batch-independent -> computed outside the kernel (no per-row HBM write).
    std = jnp.broadcast_to(
        jnp.exp(jnp.asarray(params["log_std"], jnp.float32)), (B, action_dim))

    # Small-batch fallback: at RL-rollout sizes pallas_call is pure launch overhead.
    if B < xla_fallback_below:
        return _dense_forward(state, params, gate_idx, hidden_dim), std

    in_pad = _round_up(d_in + 1, 8)      # +1 spare column carries 1.0 -> folds b1 into W1
    out_pad = _round_up(action_dim, 8)

    num_tc, vmem_cap = _chip_info()
    tile_b = _choose_tile(B, in_pad, out_pad, num_tc, vmem_cap, tile_b_max)
    B_p = _round_up(B, tile_b)

    gated_dim = max(gate_idx) + 1
    gsel_np = np.zeros((gated_dim, hidden_dim), dtype=np.float32)
    for i, g in enumerate(gate_idx):
        gsel_np[g, i] = 1.0              # gate[i] = pre[gate_idx[i]]
    gsel = jnp.asarray(gsel_np)

    # Fold the gate-selection matmul into the weights (offline, exact column gather);
    # fold b1 into wc1 row `d_in` via the ones-column of x.
    wc1, _ = _fuse_block_weight(params["w1"], params["b1"], gsel, hidden_dim,
                                in_pad, bias_row=d_in)
    wc2, bc2 = _fuse_block_weight(params["w2"], params["b2"], gsel, hidden_dim, LANE)

    # INVARIANT: wc2 / w3 rows >= hidden_dim stay zero so garbage gate lanes of the
    # previous block's output never propagate (required by the roll-based packing).
    w3 = jnp.zeros((LANE, out_pad), jnp.float32).at[:hidden_dim, :action_dim].set(
        jnp.asarray(params["w3"], jnp.float32)).astype(jnp.bfloat16)
    b3 = jnp.zeros((1, out_pad), jnp.float32).at[0, :action_dim].set(
        jnp.asarray(params["b3"], jnp.float32))

    x_p = jnp.zeros((B_p, in_pad), jnp.float32)
    x_p = x_p.at[:B, :d_in].set(state)
    x_p = x_p.at[:B, d_in].set(1.0)      # ones column -> exact b1 fold

    # Explicit scoped-VMEM limit: v5e's default is only 16 MiB, v7x has 64 MiB total.
    est_vmem = (tile_b * _per_row_vmem_bytes(in_pad, out_pad)
                + 2 * 2 * (in_pad * LANE + LANE * LANE + LANE * out_pad)   # bf16 weights, 2x buf
                + 4 * 2 * (LANE + out_pad))                                 # f32 biases, 2x buf
    vmem_limit = int(min(48 << 20, max(16 << 20, 2 * est_vmem)))

    full = lambda i: (0, 0)
    batch = lambda i: (i, 0)

    mean_p = pl.pallas_call(
        _actor_kernel,
        out_shape=jax.ShapeDtypeStruct((B_p, out_pad), jnp.float32),
        grid=(B_p // tile_b,),
        in_specs=[
            pl.BlockSpec((tile_b, in_pad), batch),   # x   (f32, narrow lanes)
            pl.BlockSpec((in_pad, LANE), full),      # fused W1 (+b1 row)  bf16
            pl.BlockSpec((LANE, LANE), full),        # fused W2            bf16
            pl.BlockSpec((LANE, out_pad), full),     # W3                  bf16
            pl.BlockSpec((1, LANE), full),           # b2 (f32, gate-folded)
            pl.BlockSpec((1, out_pad), full),        # b3 (f32)
        ],
        out_specs=pl.BlockSpec((tile_b, out_pad), batch),
        compiler_params=pltpu.CompilerParams(
            dimension_semantics=("parallel",),
            vmem_limit_bytes=vmem_limit),
    )(x_p, wc1, wc2, w3, bc2, b3)

    return mean_p[:B, :action_dim], std


# ----------------------------------------------------------------------------------
# Deterministic synthetic parameter construction (shapes from __init__)
# ----------------------------------------------------------------------------------
def make_params(key, d_in, hidden_dim, gated_dim, action_dim, log_std=0.0):
    k1, k2, k3 = jax.random.split(key, 3)
    return {
        "w1": jax.random.normal(k1, (d_in, gated_dim), jnp.float32) / np.sqrt(d_in),
        "b1": jnp.zeros((gated_dim,), jnp.float32),
        "w2": jax.random.normal(k2, (hidden_dim, gated_dim), jnp.float32) / np.sqrt(hidden_dim),
        "b2": jnp.zeros((gated_dim,), jnp.float32),
        # network[-1].weight.data.mul_(0.1); network[-1].bias.data.mul_(0.0)
        "w3": 0.1 * jax.random.normal(k3, (hidden_dim, action_dim), jnp.float32) / np.sqrt(hidden_dim),
        "b3": jnp.zeros((action_dim,), jnp.float32),
        "log_std": jnp.ones((1, action_dim), jnp.float32) * log_std,
    }


def reference_forward(state, params, gate_idx, hidden_dim, mxu_dtype=None):
    """Pure-JAX reference.  mxu_dtype=jnp.bfloat16 mimics the kernel's MXU operand cast."""
    idx = np.asarray(gate_idx)

    def dot(a, b):
        if mxu_dtype is not None:
            return jnp.dot(a.astype(mxu_dtype), b.astype(mxu_dtype),
                           preferred_element_type=jnp.float32)
        return jnp.dot(a, b, precision=jax.lax.Precision.HIGHEST)

    def block(h, w, b):
        pre = dot(h, jnp.asarray(w, jnp.float32)) + jnp.asarray(b, jnp.float32)
        return jax.nn.sigmoid(pre[:, idx]) * pre[:, :hidden_dim]

    h = block(jnp.asarray(state, jnp.float32), params["w1"], params["b1"])
    h = block(h, params["w2"], params["b2"])
    out = dot(h, jnp.asarray(params["w3"], jnp.float32)) + jnp.asarray(params["b3"], jnp.float32)
    mean = jnp.tanh(out)
    std = jnp.exp(jnp.broadcast_to(jnp.asarray(params["log_std"], jnp.float32), mean.shape))
    return mean, std


if __name__ == "__main__":
    # rep_in = Vector(SO2eR3)*6 + Scalar(Trivial1)*2 + Vector(Trivial3) -> 6*3 + 2 + 3 = 23
    D_IN = 23
    ACTION_DIM = 4          # rep_out = Scalar + Vector(Trivial3) -> 1 + 3
    ACTOR_HIDDEN = 32
    LOG_STD = 0.0

    hidden_dim, gate_idx, num_gates = uniform_rep_structure(ACTOR_HIDDEN, d=3)
    gated_dim = hidden_dim + num_gates   # 32 + 4 = 36

    key = jax.random.PRNGKey(0)
    k_params, k_state, k_big = jax.random.split(key, 3)
    params = make_params(k_params, D_IN, hidden_dim, gated_dim, ACTION_DIM, LOG_STD)

    # --- Small batch: force the Pallas kernel path (xla_fallback_below=0). ---
    B = 2
    state = jax.random.normal(k_state, (B, D_IN), jnp.float32)
    mean, std = emlp_mono_actor_forward(state, params, gate_idx, hidden_dim,
                                        ACTION_DIM, xla_fallback_below=0)
    jax.block_until_ready((mean, std))
    assert mean.shape == (B, ACTION_DIM) and std.shape == (B, ACTION_DIM)

    mean_bf_ref, std_ref = reference_forward(state, params, gate_idx, hidden_dim,
                                             mxu_dtype=jnp.bfloat16)
    mean_hp_ref, _ = reference_forward(state, params, gate_idx, hidden_dim)
    # Tight, like-for-like check (bf16 MXU operands, f32 accumulation).
    np.testing.assert_allclose(np.asarray(mean), np.asarray(mean_bf_ref), atol=1e-4, rtol=1e-4)
    # Looser check vs full-f32 reference (documents the bf16-operand error budget).
    np.testing.assert_allclose(np.asarray(mean), np.asarray(mean_hp_ref), atol=5e-3, rtol=5e-3)
    np.testing.assert_allclose(np.asarray(std), np.asarray(std_ref), atol=1e-6, rtol=1e-6)

    # --- Small batch through the XLA fallback path (default threshold). ---
    mean_fb, std_fb = emlp_mono_actor_forward(state, params, gate_idx, hidden_dim, ACTION_DIM)
    jax.block_until_ready((mean_fb, std_fb))
    np.testing.assert_allclose(np.asarray(mean_fb), np.asarray(mean_hp_ref), atol=5e-3, rtol=5e-3)
    np.testing.assert_allclose(np.asarray(std_fb), np.asarray(std_ref), atol=1e-6, rtol=1e-6)

    # --- Large batch: exercises the big-tile / (v7x) dual-TC sharded path. ---
    B_BIG = 4096
    state_big = jax.random.normal(k_big, (B_BIG, D_IN), jnp.float32)
    mean_b, std_b = emlp_mono_actor_forward(state_big, params, gate_idx, hidden_dim, ACTION_DIM)
    jax.block_until_ready((mean_b, std_b))
    assert mean_b.shape == (B_BIG, ACTION_DIM) and std_b.shape == (B_BIG, ACTION_DIM)
    mean_b_ref, _ = reference_forward(state_big, params, gate_idx, hidden_dim,
                                      mxu_dtype=jnp.bfloat16)
    np.testing.assert_allclose(np.asarray(mean_b), np.asarray(mean_b_ref), atol=2e-4, rtol=1e-3)

    print("KERNEL_OK")
</pallas_src>

<mosaic_0001>
module attributes {stable_mosaic.version = 11 : i64} {
  func.func @_actor_kernel(%arg0: i32, %arg1: memref<8x24xf32, #tpu.memory_space<vmem>>, %arg2: memref<24x128xbf16, #tpu.memory_space<vmem>>, %arg3: memref<128x128xbf16, #tpu.memory_space<vmem>>, %arg4: memref<128x8xbf16, #tpu.memory_space<vmem>>, %arg5: memref<1x128xf32, #tpu.memory_space<vmem>>, %arg6: memref<1x8xf32, #tpu.memory_space<vmem>>, %arg7: memref<8x8xf32, #tpu.memory_space<vmem>>) attributes {dimension_semantics = [#tpu.dimension_semantics<parallel>], iteration_bounds = array<i64: 1>, scalar_prefetch = 0 : i64, scratch_operands = 0 : i64, tpu.core_type = #tpu.core_type<tc>, window_params = [{transform_indices = @transform_0, window_bounds = array<i64: 8, 24>}, {pipeline_mode = #tpu.pipeline_mode<synchronous>, transform_indices = @transform_1, window_bounds = array<i64: 24, 128>}, {pipeline_mode = #tpu.pipeline_mode<synchronous>, transform_indices = @transform_2, window_bounds = array<i64: 128, 128>}, {pipeline_mode = #tpu.pipeline_mode<synchronous>, transform_indices = @transform_3, window_bounds = array<i64: 128, 8>}, {pipeline_mode = #tpu.pipeline_mode<synchronous>, transform_indices = @transform_4, window_bounds = array<i64: 1, 128>}, {pipeline_mode = #tpu.pipeline_mode<synchronous>, transform_indices = @transform_5, window_bounds = array<i64: 1, 8>}, {transform_indices = @transform_6, window_bounds = array<i64: 8, 8>}]} {
    %c0 = arith.constant 0 : index
    %c0_0 = arith.constant 0 : index
    %0 = vector.load %arg1[%c0, %c0_0] : memref<8x24xf32, #tpu.memory_space<vmem>>, vector<8x24xf32>
    %1 = arith.truncf %0 : vector<8x24xf32> to vector<8x24xbf16>
    %c0_1 = arith.constant 0 : index
    %c0_2 = arith.constant 0 : index
    %2 = vector.load %arg2[%c0_1, %c0_2] : memref<24x128xbf16, #tpu.memory_space<vmem>>, vector<24x128xbf16>
    %cst = arith.constant dense<0.000000e+00> : vector<8x128xf32>
    %3 = tpu.matmul %1, %2, %cst {dimension_numbers = #tpu.dot_dimension_numbers<[1], [0], [0], [1], [0, 0, 1, 1], [], []>} : vector<8x24xbf16>, vector<24x128xbf16>, vector<8x128xf32> -> vector<8x128xf32>
    %c64_i32 = arith.constant 64 : i32
    %4 = tpu.dynamic_rotate %3 by %c64_i32 dim 1 : vector<8x128xf32>, i32 -> vector<8x128xf32>
    %cst_3 = arith.constant 5.000000e-01 : f32
    %5 = vector.broadcast %cst_3 : f32 to vector<8x128xf32>
    %6 = arith.mulf %5, %4 : vector<8x128xf32>
    %7 = math.tanh %6 : vector<8x128xf32>
    %cst_4 = arith.constant 5.000000e-01 : f32
    %8 = vector.broadcast %cst_4 : f32 to vector<8x128xf32>
    %9 = arith.mulf %8, %7 : vector<8x128xf32>
    %cst_5 = arith.constant 5.000000e-01 : f32
    %10 = vector.broadcast %cst_5 : f32 to vector<8x128xf32>
    %11 = arith.addf %9, %10 : vector<8x128xf32>
    %12 = arith.mulf %11, %3 : vector<8x128xf32>
    %13 = arith.truncf %12 : vector<8x128xf32> to vector<8x128xbf16>
    %c0_6 = arith.constant 0 : index
    %c0_7 = arith.constant 0 : index
    %14 = vector.load %arg3[%c0_6, %c0_7] : memref<128x128xbf16, #tpu.memory_space<vmem>>, vector<128x128xbf16>
    %cst_8 = arith.constant dense<0.000000e+00> : vector<8x128xf32>
    %15 = tpu.matmul %13, %14, %cst_8 {dimension_numbers = #tpu.dot_dimension_numbers<[1], [0], [0], [1], [0, 0, 1, 1], [], []>} : vector<8x128xbf16>, vector<128x128xbf16>, vector<8x128xf32> -> vector<8x128xf32>
    %c0_9 = arith.constant 0 : index
    %c0_10 = arith.constant 0 : index
    %16 = vector.load %arg5[%c0_9, %c0_10] : memref<1x128xf32, #tpu.memory_space<vmem>>, vector<1x128xf32>
    %17 = vector.broadcast %16 : vector<1x128xf32> to vector<8x128xf32>
    %18 = arith.addf %15, %17 : vector<8x128xf32>
    %c64_i32_11 = arith.constant 64 : i32
    %19 = tpu.dynamic_rotate %18 by %c64_i32_11 dim 1 : vector<8x128xf32>, i32 -> vector<8x128xf32>
    %cst_12 = arith.constant 5.000000e-01 : f32
    %20 = vector.broadcast %cst_12 : f32 to vector<8x128xf32>
    %21 = arith.mulf %20, %19 : vector<8x128xf32>
    %22 = math.tanh %21 : vector<8x128xf32>
    %cst_13 = arith.constant 5.000000e-01 : f32
    %23 = vector.broadcast %cst_13 : f32 to vector<8x128xf32>
    %24 = arith.mulf %23, %22 : vector<8x128xf32>
    %cst_14 = arith.constant 5.000000e-01 : f32
    %25 = vector.broadcast %cst_14 : f32 to vector<8x128xf32>
    %26 = arith.addf %24, %25 : vector<8x128xf32>
    %27 = arith.mulf %26, %18 : vector<8x128xf32>
    %28 = arith.truncf %27 : vector<8x128xf32> to vector<8x128xbf16>
    %c0_15 = arith.constant 0 : index
    %c0_16 = arith.constant 0 : index
    %29 = vector.load %arg4[%c0_15, %c0_16] : memref<128x8xbf16, #tpu.memory_space<vmem>>, vector<128x8xbf16>
    %cst_17 = arith.constant dense<0.000000e+00> : vector<8x8xf32>
    %30 = tpu.matmul %28, %29, %cst_17 {dimension_numbers = #tpu.dot_dimension_numbers<[1], [0], [0], [1], [0, 0, 1, 1], [], []>} : vector<8x128xbf16>, vector<128x8xbf16>, vector<8x8xf32> -> vector<8x8xf32>
    %c0_18 = arith.constant 0 : index
    %c0_19 = arith.constant 0 : index
    %31 = vector.load %arg6[%c0_18, %c0_19] : memref<1x8xf32, #tpu.memory_space<vmem>>, vector<1x8xf32>
    %32 = vector.broadcast %31 : vector<1x8xf32> to vector<8x8xf32>
    %33 = arith.addf %30, %32 : vector<8x8xf32>
    %34 = math.tanh %33 : vector<8x8xf32>
    %c0_20 = arith.constant 0 : index
    %c0_21 = arith.constant 0 : index
    %35 = vector.load %arg7[%c0_20, %c0_21] : memref<8x8xf32, #tpu.memory_space<vmem>>, vector<8x8xf32>
    tpu.vector_store %arg7[%c0_20, %c0_21], %34 {strides = array<i32>} : memref<8x8xf32, #tpu.memory_space<vmem>>, vector<8x8xf32>,
    return
  }
  func.func @transform_0(%arg0: i32) -> (i32, i32) {
    %c0_i32 = arith.constant 0 : i32
    %c0_i32_0 = arith.constant 0 : i32
    return %arg0, %c0_i32 : i32, i32
  }
  func.func @transform_1(%arg0: i32) -> (i32, i32) {
    %c0_i32 = arith.constant 0 : i32
    %c0_i32_0 = arith.constant 0 : i32
    %c0_i32_1 = arith.constant 0 : i32
    return %c0_i32, %c0_i32_0 : i32, i32
  }
  func.func @transform_2(%arg0: i32) -> (i32, i32) {
    %c0_i32 = arith.constant 0 : i32
    %c0_i32_0 = arith.constant 0 : i32
    %c0_i32_1 = arith.constant 0 : i32
    return %c0_i32, %c0_i32_0 : i32, i32
  }
  func.func @transform_3(%arg0: i32) -> (i32, i32) {
    %c0_i32 = arith.constant 0 : i32
    %c0_i32_0 = arith.constant 0 : i32
    %c0_i32_1 = arith.constant 0 : i32
    return %c0_i32, %c0_i32_0 : i32, i32
  }
  func.func @transform_4(%arg0: i32) -> (i32, i32) {
    %c0_i32 = arith.constant 0 : i32
    %c0_i32_0 = arith.constant 0 : i32
    %c0_i32_1 = arith.constant 0 : i32
    return %c0_i32, %c0_i32_0 : i32, i32
  }
  func.func @transform_5(%arg0: i32) -> (i32, i32) {
    %c0_i32 = arith.constant 0 : i32
    %c0_i32_0 = arith.constant 0 : i32
    %c0_i32_1 = arith.constant 0 : i32
    return %c0_i32, %c0_i32_0 : i32, i32
  }
  func.func @transform_6(%arg0: i32) -> (i32, i32) {
    %c0_i32 = arith.constant 0 : i32
    %c0_i32_0 = arith.constant 0 : i32
    return %arg0, %c0_i32 : i32, i32
  }
}

</mosaic_0001>

<bundles_post_ra>
// kernel: tpu_custom_call.1
= control target key start
LH: loop header
LB: loop body
LE: loop exit
PB: predicated region body
PF: predicated region fallthrough
CT: control target
= control target key end

     0   :  { %11 = vsyncpa [#allocation3], 0  ;;  %s573_s0 = inlined_call_operand.hbm [shape: f32[8,24], index: 0, kind: input, shape index: {}]   ;;  %s574_s1 = inlined_call_operand.hbm [shape: bf16[24,128], index: 1, kind: input, shape index: {}]   ;;  %s575_s2 = inlined_call_operand.vmem [shape: bf16[128,128], index: 2, kind: input, shape index: {}]   ;;  %s576_s3 = inlined_call_operand.vmem [shape: bf16[128,8], index: 3, kind: input, shape index: {}]   ;;  %s577_s4 = inlined_call_operand.vmem [shape: f32[1,128], index: 4, kind: input, shape index: {}]   ;;  %s578_s5 = inlined_call_operand.vmem [shape: f32[1,8], index: 5, kind: input, shape index: {}]   ;;  %s579_s6 = inlined_call_operand.hbm [shape: f32[8,8], index: 6, kind: output, shape index: {}]  }
   0x1   :  { %12 = vsyncpa [#allocation6], 0 }
   0x2   :  { %13 = vsyncpa [#allocation4], 0  ;;  %s19_s23 = sshll.u32 %s573_s0, 4  ;;  %s466_s24 = smov [#allocation2]   ;;  %s20_s23 = int_to_ptr.hbm [resolvable:$true] %s19_s23 }
   0x3   :  { %s21_s25 = sshll.u32 %s466_s24, 4  ;;  %s29_s28 = sshll.u32 %s574_s1, 4  ;;  %s22_s25 = int_to_ptr.vmem [resolvable:$true] %s21_s25  ;;  %s30_s28 = int_to_ptr.hbm [resolvable:$true] %s29_s28 }
   0x4   :  { %24 = dma.hbm_to_vmem [thread:$0]  %s20_s23, 128, %s22_s25, [#allocation3]  }
   0x5   :  { %s467_s29 = smov [#allocation5]   ;;  %s468_s7 = smov 64  }
   0x6   :  { %s31_s30 = sshll.u32 %s467_s29, 4  ;;  %s469_s8 = smov 4   ;;  %s32_s30 = int_to_ptr.vmem [resolvable:$true] %s31_s30 }
   0x7   :  { %37 = dma.hbm_to_vmem [thread:$0]  %s30_s28, 192, %s32_s30, [#allocation6], %s468_s7, %s468_s7, %s469_s8  }
   0x8   :  { %460 = dma.done.wait [#allocation3], 128  }
   0x9   :  { %461 = vsyncadd [#allocation3], 4294967168 }
   0xa   :  { %462 = dma.done.wait [#allocation6], 192  }
   0xb   :  { %463 = vsyncadd [#allocation6], 4294967104  ;;  %v59_v0 = vld [vmem:[#allocation5 + $0x8] sm:$0xf]  ;;  %vm73_vm0 = vcmask 1043456   ;;  %v358_v4 = vld [vmem:[#allocation5] sm:$0xff] }
   0xc   :  { %v65_v1 = vunpack.c.l.b16 %v59_v0  ;;  %v55_v5 = vld [vmem:[#allocation2] sm:$0xff]  ;;  %vm69_vm1 = vcmask 195584   ;;  %v366_v7 = vld [vmem:[%s575_s2 + $0x38] sm:$0xff]  ;;  %v365_v8 = vld [vmem:[%s575_s2 + $0x30] sm:$0xff]  ;;  %s470_s15 = smov [#allocation7]   ;;  %s278_s18 = sshll.u32 %s579_s6, 4  ;;  %s279_s18 = int_to_ptr.hbm [resolvable:$true] %s278_s18 }
   0xd   :  { %v56_v6 = vpack.c.bf16 %v55_v5, %v55_v5  ;;  %166 = vmatpush.bf16.msra.mxu1 %v366_v7  ;;  %v364_v9 = vld [vmem:[%s575_s2 + $0x28] sm:$0xff]  ;;  %v363_v10 = vld [vmem:[%s575_s2 + $0x20] sm:$0xff]  ;;  %v362_v13 = vld [vmem:[%s575_s2 + $0x18] sm:$0xff]  ;;  %s276_s16 = sshll.u32 %s470_s15, 4  ;;  %vm269_vm2 = vcmask 64512   ;;  %s277_s16 = int_to_ptr.vmem [resolvable:$true] %s276_s16 }
   0xe   :  { %v67_v2 = vpack.c.b16 %v65_v1, %v65_v1  ;;  %v361_v14 = vld [vmem:[%s575_s2 + $0x10] sm:$0xff]  ;;  %v360_v15 = vld [vmem:[%s575_s2 + $0x8] sm:$0xff]  ;;  %v359_v16 = vld [vmem:[%s575_s2] sm:$0xff] }
   0xf   :  { %v374_v24 = vld [vmem:[%s576_s3 + $0x38] sm:$0xff]  ;;  %v373_v25 = vld [vmem:[%s576_s3 + $0x30] sm:$0xff]  ;;  %v372_v26 = vld [vmem:[%s576_s3 + $0x28] sm:$0xff] }
  0x10   :  { %v75_v3 = vsel %vm73_vm0, %v67_v2, 0  ;;  %255 = vmatpush.bf16.msra.mxu2 %v374_v24  ;;  %v371_v27 = vld [vmem:[%s576_s3 + $0x20] sm:$0xff]  ;;  %v370_v32 = vld [vmem:[%s576_s3 + $0x18] sm:$0xff]  ;;  %v369_v33 = vld [vmem:[%s576_s3 + $0x10] sm:$0xff] }
  0x11   :  { %83 = vmatpush.bf16.msra.mxu0 %v75_v3  ;;  %167 = vmatpush.bf16.msra.mxu1 %v365_v8  ;;  %v380_v28 = vld [vmem:[%s577_s4] ss:$0 sm:$0xff]  ;;  %v368_v34 = vld [vmem:[%s576_s3 + $0x8] sm:$0xff] }
  0x12   :  { %v367_v35 = vld [vmem:[%s576_s3] sm:$0xff] }
  0x13   :  { %v381_v43 = vld [vmem:[%s578_s5] ss:$0 sm:$0xff] }
  0x14   :  { %256 = vmatpush.bf16.msra.mxu2 %v373_v25 }
  0x15   :  { %84 = vmatpush.bf16.msra.mxu0 %v358_v4  ;;  %168 = vmatpush.bf16.msra.mxu1 %v364_v9 }
  0x18   :  { %293 = vmatmul.msk.bf16.vlgmr.msra.gmra.mxu0 %vm69_vm1, %v56_v6  ;;  %257 = vmatpush.bf16.msra.mxu2 %v372_v26 }
  0x19   :  { %169 = vmatpush.bf16.msra.mxu1 %v363_v10 }
  0x1c   :  { %258 = vmatpush.bf16.msra.mxu2 %v371_v27 }
  0x1d   :  { %170 = vmatpush.bf16.msra.mxu1 %v362_v13 }
  0x20   :  { %259 = vmatpush.bf16.msra.mxu2 %v370_v32 }
  0x21   :  { %171 = vmatpush.bf16.msra.mxu1 %v361_v14 }
  0x24   :  { %260 = vmatpush.bf16.msra.mxu2 %v369_v33 }
  0x25   :  { %172 = vmatpush.bf16.msra.mxu1 %v360_v15 }
  0x28   :  { %261 = vmatpush.bf16.msra.mxu2 %v368_v34 }
  0x29   :  { %173 = vmatpush.bf16.msra.mxu1 %v359_v16 }
  0x2c   :  { %262 = vmatpush.bf16.msra.mxu2 %v367_v35 }
  0x95   :  { %v86_v11 = vpop.f32.mrf.mxu0 }
  0x96   :  { %90 = vrot.lane.b32.xlu0 %v86_v11, %s468_s7 }
  0x9d   :  { %v88_v12 = vpop.f32.mrf.mxu0 }
 0x108   :  { %v91_v17 = vpop.permute.xlu0 %90 }
 0x109   :  { %v92_v18 = vmul.f32 0.5, %v91_v17 }
 0x10b   :  { %382 = vtanh.f32 %v92_v18 }
 0x111   :  { %v383_v19 = vpop.eup %382 }
 0x112   :  { %v94_v20 = vmul.f32 0.5, %v383_v19 }
 0x114   :  { %v95_v21 = vadd.f32 0.5, %v94_v20 }
 0x116   :  { %v96_v22 = vmul.f32 %v95_v21, %v86_v11 }
 0x118   :  { %v97_v23 = vpack.c.bf16 %v96_v22, %v96_v22 }
 0x11a   :  { %174 = vmatmul.bf16.vlgmr.msra.gmra.mxu1 %v97_v23 }
 0x197   :  { %v175_v29 = vpop.f32.mrf.mxu1 }
 0x198   :  { %v176_v30 = vadd.f32 %v380_v28, %v175_v29 }
 0x19a   :  { %179 = vrot.lane.b32.xlu0 %v176_v30, %s468_s7 }
 0x19f   :  { %v177_v31 = vpop.f32.mrf.mxu1 }
 0x20c   :  { %v180_v36 = vpop.permute.xlu0 %179 }
 0x20d   :  { %v181_v37 = vmul.f32 0.5, %v180_v36 }
 0x20f   :  { %384 = vtanh.f32 %v181_v37 }
 0x215   :  { %v385_v38 = vpop.eup %384 }
 0x216   :  { %v183_v39 = vmul.f32 0.5, %v385_v38 }
 0x218   :  { %v184_v40 = vadd.f32 0.5, %v183_v39 }
 0x21a   :  { %v185_v41 = vmul.f32 %v184_v40, %v176_v30 }
 0x21c   :  { %v186_v42 = vpack.c.bf16 %v185_v41, %v185_v41 }
 0x21e   :  { %263 = vmatmul.bf16.vlgmr.msra.gmra.mxu2 %v186_v42 }
 0x2a1   :  { %v264_v44 = vpop.f32.mrf.mxu2 }
 0x2a2   :  { %v265_v45 = vadd.f32 %v381_v43, %v264_v44 }
 0x2a4   :  { %386 = vtanh.f32 %v265_v45 }
 0x2a9   :  { %v266_v46 = vpop.f32.mrf.mxu2 }
 0x2aa   :  { %v387_v47 = vpop.eup %386 }
 0x2ab   :  { %270 = vst.msk [vmem:[#allocation7] sm:$0xff] %vm269_vm2, %v387_v47 }
 0x2ac   :  { %281 = dma.vmem_to_hbm [thread:$0]  %s277_s16, 128, %s279_s18, [#allocation4]  }
 0x2ad   :  { %464 = dma.done.wait [#allocation4], 128  }
 0x2ae   :  { %465 = vsyncadd [#allocation4], 4294967168 }
 0x2af   :  { %286 = vsyncpa [#allocation3], 1 }
 0x2b0   :  { %287 = vsyncpa [#allocation6], 1 }
 0x2b1   :  { %288 = vsyncpa [#allocation4], 1 }

</bundles_post_ra>
